<compile_context>
chip_gen: v5e
topology: v5e:2x2
jax: 0.10.0
libtpu: 0.0.40
codegen_flags: <defaults>
</compile_context>

<pallas_src>
import functools

import jax
import jax.numpy as jnp
from jax import lax
from jax.experimental import pallas as pl
from jax.experimental.pallas import tpu as pltpu


def _round_up(x: int, m: int) -> int:
    return ((x + m - 1) // m) * m


def _agg_then_project_kernel(at_ref, hs_ref, dinv_ref, w_ref, o_ref, acc_ref):
    """acc[v,:] += A^T[v,u] @ H_s[u,:]; finalize: (acc * din^-1/2) @ W."""
    k = pl.program_id(1)

    @pl.when(k == 0)
    def _init():
        acc_ref[...] = jnp.zeros_like(acc_ref)

    # bf16 x bf16 on the MXU, f32 accumulation.
    acc_ref[...] += jnp.dot(at_ref[...], hs_ref[...],
                            preferred_element_type=jnp.float32)

    @pl.when(k == pl.num_programs(1) - 1)
    def _finalize():
        agg = acc_ref[...] * dinv_ref[...]                     # (tm, Din_p) * (tm, 1)
        o_ref[...] = jnp.dot(
            agg, w_ref[...], preferred_element_type=jnp.float32
        ).astype(o_ref.dtype)


def _project_then_agg_kernel(at_ref, hp_ref, dinv_ref, o_ref, acc_ref):
    """acc[v,:] += A^T[v,u] @ (H_s @ W)[u,:]; finalize: acc * din^-1/2."""
    k = pl.program_id(1)

    @pl.when(k == 0)
    def _init():
        acc_ref[...] = jnp.zeros_like(acc_ref)

    acc_ref[...] += jnp.dot(at_ref[...], hp_ref[...],
                            preferred_element_type=jnp.float32)

    @pl.when(k == pl.num_programs(1) - 1)
    def _finalize():
        o_ref[...] = (acc_ref[...] * dinv_ref[...]).astype(o_ref.dtype)


@functools.partial(jax.jit, static_argnames=("tile",))
def graph_conv(adj, features, weight, *, tile: int = 512):
    """One DGL-style GraphConv layer (norm='both', bias=False) via Pallas."""
    n, in_dim = features.shape
    out_dim = weight.shape[1]

    # ---- degree / normalization pre-pass (plain XLA, one-off) ---------------
    deg_out = jnp.maximum(jnp.sum(adj, axis=1, keepdims=True), 1.0)   # (N, 1)
    deg_in = jnp.maximum(jnp.sum(adj, axis=0, keepdims=True), 1.0)    # (1, N)
    dout_inv = lax.rsqrt(deg_out)                                     # (N, 1)
    din_inv = lax.rsqrt(deg_in).T                                     # (N, 1)

    # Source-side normalization folded into the features (f32 VPU math).
    h_s = features.astype(jnp.float32) * dout_inv                     # (N, Din)

    # ---- padding to lane-dense / tile-aligned shapes -------------------------
    tm = tk = min(tile, _round_up(n, 128))
    n_pad = _round_up(n, tm)
    din_pad = _round_up(in_dim, 128)
    dout_pad = _round_up(out_dim, 128)

    # Pre-transposed adjacency in bf16 (0/1 is exact) -> plain last-dim
    # contraction inside the kernel, no XLU transpose of the A tile.
    at = jnp.zeros((n_pad, n_pad), jnp.bfloat16).at[:n, :n].set(
        adj.T.astype(jnp.bfloat16))
    dinv_p = jnp.zeros((n_pad, 1), jnp.float32).at[:n, :].set(din_inv)

    grid = (n_pad // tm, n_pad // tk)
    project_first = dout_pad < din_pad   # put W on the narrow side of the agg

    if project_first:
        # One-off dense projection in full f32, then aggregate the narrow
        # bf16 features inside the kernel.
        h_p = h_s @ weight.astype(jnp.float32)                         # (N, Dout)
        hp_p = jnp.zeros((n_pad, dout_pad), jnp.bfloat16).at[:n, :out_dim].set(
            h_p.astype(jnp.bfloat16))

        cost = pl.CostEstimate(
            flops=2 * n_pad * n_pad * dout_pad,
            transcendentals=0,
            bytes_accessed=(n_pad * n_pad * 2          # A^T (bf16)
                            + n_pad * dout_pad * 2     # H_s @ W (bf16)
                            + n_pad * 4                # din^-1/2
                            + n_pad * dout_pad * 4),   # out
        )

        out_padded = pl.pallas_call(
            _project_then_agg_kernel,
            out_shape=jax.ShapeDtypeStruct((n_pad, dout_pad), jnp.float32),
            grid_spec=pltpu.PrefetchScalarGridSpec(
                num_scalar_prefetch=0,
                grid=grid,
                in_specs=[
                    pl.BlockSpec((tm, tk), lambda i, k: (i, k)),         # A^T tile
                    pl.BlockSpec((tk, dout_pad), lambda i, k: (k, 0)),   # (H_s W) tile
                    pl.BlockSpec((tm, 1), lambda i, k: (i, 0)),          # din^-1/2
                ],
                out_specs=pl.BlockSpec((tm, dout_pad), lambda i, k: (i, 0)),
                scratch_shapes=[pltpu.VMEM((tm, dout_pad), jnp.float32)],
            ),
            compiler_params=pltpu.CompilerParams(
                dimension_semantics=("parallel", "arbitrary"),
            ),
            cost_estimate=cost,
        )(at, hp_p, dinv_p)
    else:
        hs_p = jnp.zeros((n_pad, din_pad), jnp.bfloat16).at[:n, :in_dim].set(
            h_s.astype(jnp.bfloat16))
        w_p = jnp.zeros((din_pad, dout_pad), jnp.float32).at[:in_dim, :out_dim].set(
            weight.astype(jnp.float32))

        cost = pl.CostEstimate(
            flops=2 * n_pad * n_pad * din_pad + 2 * n_pad * din_pad * dout_pad,
            transcendentals=0,
            bytes_accessed=(n_pad * n_pad * 2          # A^T (bf16)
                            + n_pad * din_pad * 2      # H_s (bf16)
                            + n_pad * 4                # din^-1/2
                            + din_pad * dout_pad * 4   # W
                            + n_pad * dout_pad * 4),   # out
        )

        out_padded = pl.pallas_call(
            _agg_then_project_kernel,
            out_shape=jax.ShapeDtypeStruct((n_pad, dout_pad), jnp.float32),
            grid_spec=pltpu.PrefetchScalarGridSpec(
                num_scalar_prefetch=0,
                grid=grid,
                in_specs=[
                    pl.BlockSpec((tm, tk), lambda i, k: (i, k)),             # A^T tile
                    pl.BlockSpec((tk, din_pad), lambda i, k: (k, 0)),        # H_s tile
                    pl.BlockSpec((tm, 1), lambda i, k: (i, 0)),              # din^-1/2
                    pl.BlockSpec((din_pad, dout_pad), lambda i, k: (0, 0)),  # W resident
                ],
                out_specs=pl.BlockSpec((tm, dout_pad), lambda i, k: (i, 0)),
                scratch_shapes=[pltpu.VMEM((tm, din_pad), jnp.float32)],
            ),
            compiler_params=pltpu.CompilerParams(
                dimension_semantics=("parallel", "arbitrary"),
            ),
            cost_estimate=cost,
        )(at, hs_p, dinv_p, w_p)

    return out_padded[:n, :out_dim]


class GNNModelPallas:
    """Mirrors GNNModel: a ModuleList with a single GraphConv layer."""

    def __init__(self, in_dim: int, out_dim: int, key):
        # DGL GraphConv initializes its weight with Xavier/Glorot uniform.
        bound = (6.0 / (in_dim + out_dim)) ** 0.5
        self.weights = [
            jax.random.uniform(
                key, (in_dim, out_dim), jnp.float32, minval=-bound, maxval=bound
            )
        ]

    def __call__(self, adj, features):
        for w in self.weights:
            features = graph_conv(adj, features, w)
        return features


def _reference_f32(adj, features, weight):
    dout_inv = lax.rsqrt(jnp.maximum(adj.sum(axis=1, keepdims=True), 1.0))
    din_inv = lax.rsqrt(jnp.maximum(adj.sum(axis=0, keepdims=True), 1.0))
    h_s = features * dout_inv
    return (din_inv.T * (adj.T @ h_s)) @ weight


if __name__ == "__main__":
    key = jax.random.PRNGKey(0)
    k_adj, k_feat, k_w, k_adj2, k_feat2, k_w2 = jax.random.split(key, 6)

    # ---- case 1: out_dim >= in_dim -> aggregate-then-project path -----------
    N, IN_DIM, OUT_DIM = 16, 8, 32
    adj = (jax.random.uniform(k_adj, (N, N)) < 0.3).astype(jnp.float32)
    features = jax.random.normal(k_feat, (N, IN_DIM), dtype=jnp.float32)

    model = GNNModelPallas(IN_DIM, OUT_DIM, k_w)
    out = jax.block_until_ready(model(adj, features))
    assert out.shape == (N, OUT_DIM)

    # Mixed-precision reference (bf16-rounded normalized features, exact bf16 A).
    dout_inv = lax.rsqrt(jnp.maximum(adj.sum(axis=1, keepdims=True), 1.0))
    din_inv = lax.rsqrt(jnp.maximum(adj.sum(axis=0, keepdims=True), 1.0))
    h_b = (features * dout_inv).astype(jnp.bfloat16).astype(jnp.float32)
    ref_mixed = (din_inv.T * (adj.T @ h_b)) @ model.weights[0]
    ref_f32 = _reference_f32(adj, features, model.weights[0])

    assert jnp.allclose(out, ref_mixed, atol=2e-3, rtol=2e-3), \
        float(jnp.max(jnp.abs(out - ref_mixed)))
    assert jnp.allclose(out, ref_f32, atol=5e-2, rtol=5e-2), \
        float(jnp.max(jnp.abs(out - ref_f32)))

    # ---- case 2: in_dim > out_dim -> project-then-aggregate path ------------
    N2, IN2, OUT2 = 24, 160, 32
    adj2 = (jax.random.uniform(k_adj2, (N2, N2)) < 0.3).astype(jnp.float32)
    features2 = jax.random.normal(k_feat2, (N2, IN2), dtype=jnp.float32)

    model2 = GNNModelPallas(IN2, OUT2, k_w2)
    out2 = jax.block_until_ready(model2(adj2, features2))
    assert out2.shape == (N2, OUT2)

    dout_inv2 = lax.rsqrt(jnp.maximum(adj2.sum(axis=1, keepdims=True), 1.0))
    din_inv2 = lax.rsqrt(jnp.maximum(adj2.sum(axis=0, keepdims=True), 1.0))
    hp_b2 = ((features2 * dout_inv2) @ model2.weights[0]
             ).astype(jnp.bfloat16).astype(jnp.float32)
    ref2_mixed = din_inv2.T * (adj2.T @ hp_b2)
    ref2_f32 = _reference_f32(adj2, features2, model2.weights[0])

    assert jnp.allclose(out2, ref2_mixed, atol=5e-3, rtol=5e-3), \
        float(jnp.max(jnp.abs(out2 - ref2_mixed)))
    assert jnp.allclose(out2, ref2_f32, atol=6e-2, rtol=6e-2), \
        float(jnp.max(jnp.abs(out2 - ref2_f32)))

    print("KERNEL_OK")
</pallas_src>

<mosaic_0001>
module attributes {stable_mosaic.version = 11 : i64} {
  func.func @_agg_then_project_kernel(%arg0: i32, %arg1: i32, %arg2: memref<128x128xbf16, #tpu.memory_space<vmem>>, %arg3: memref<128x128xbf16, #tpu.memory_space<vmem>>, %arg4: memref<128x1xf32, #tpu.memory_space<vmem>>, %arg5: memref<128x128xf32, #tpu.memory_space<vmem>>, %arg6: memref<128x128xf32, #tpu.memory_space<vmem>>, %arg7: memref<128x128xf32, #tpu.memory_space<vmem>>) attributes {dimension_semantics = [#tpu.dimension_semantics<parallel>, #tpu.dimension_semantics<arbitrary>], iteration_bounds = array<i64: 1, 1>, scalar_prefetch = 0 : i64, scratch_operands = 1 : i64, tpu.core_type = #tpu.core_type<tc>, window_params = [{transform_indices = @transform_0, window_bounds = array<i64: 128, 128>}, {transform_indices = @transform_1, window_bounds = array<i64: 128, 128>}, {transform_indices = @transform_2, window_bounds = array<i64: 128, 1>}, {pipeline_mode = #tpu.pipeline_mode<synchronous>, transform_indices = @transform_3, window_bounds = array<i64: 128, 128>}, {transform_indices = @transform_4, window_bounds = array<i64: 128, 128>}]} {
    %c0_i32 = arith.constant 0 : i32
    %0 = arith.cmpi eq, %arg1, %c0_i32 : i32
    %1 = arith.extui %0 : i1 to i32
    %c0_i32_0 = arith.constant 0 : i32
    %2 = arith.cmpi ne, %1, %c0_i32_0 : i32
    scf.if %2 {
      %cst_10 = arith.constant 0.000000e+00 : f32
      %12 = vector.broadcast %cst_10 : f32 to vector<128x128xf32>
      %c0_11 = arith.constant 0 : index
      %c0_12 = arith.constant 0 : index
      %13 = vector.load %arg7[%c0_11, %c0_12] : memref<128x128xf32, #tpu.memory_space<vmem>>, vector<128x128xf32>
      tpu.vector_store %arg7[%c0_11, %c0_12], %12 {strides = array<i32>} : memref<128x128xf32, #tpu.memory_space<vmem>>, vector<128x128xf32>,
    } else {
    }
    %c0 = arith.constant 0 : index
    %c0_1 = arith.constant 0 : index
    %3 = vector.load %arg7[%c0, %c0_1] : memref<128x128xf32, #tpu.memory_space<vmem>>, vector<128x128xf32>
    %c0_2 = arith.constant 0 : index
    %c0_3 = arith.constant 0 : index
    %4 = vector.load %arg2[%c0_2, %c0_3] : memref<128x128xbf16, #tpu.memory_space<vmem>>, vector<128x128xbf16>
    %c0_4 = arith.constant 0 : index
    %c0_5 = arith.constant 0 : index
    %5 = vector.load %arg3[%c0_4, %c0_5] : memref<128x128xbf16, #tpu.memory_space<vmem>>, vector<128x128xbf16>
    %cst = arith.constant dense<0.000000e+00> : vector<128x128xf32>
    %6 = tpu.matmul %4, %5, %cst {dimension_numbers = #tpu.dot_dimension_numbers<[1], [0], [0], [1], [0, 0, 1, 1], [], []>} : vector<128x128xbf16>, vector<128x128xbf16>, vector<128x128xf32> -> vector<128x128xf32>
    %7 = arith.addf %3, %6 : vector<128x128xf32>
    %c0_6 = arith.constant 0 : index
    %c0_7 = arith.constant 0 : index
    %8 = vector.load %arg7[%c0_6, %c0_7] : memref<128x128xf32, #tpu.memory_space<vmem>>, vector<128x128xf32>
    tpu.vector_store %arg7[%c0_6, %c0_7], %7 {strides = array<i32>} : memref<128x128xf32, #tpu.memory_space<vmem>>, vector<128x128xf32>,
    %c0_i32_8 = arith.constant 0 : i32
    %9 = arith.cmpi eq, %arg1, %c0_i32_8 : i32
    %10 = arith.extui %9 : i1 to i32
    %c0_i32_9 = arith.constant 0 : i32
    %11 = arith.cmpi ne, %10, %c0_i32_9 : i32
    scf.if %11 {
      %c0_10 = arith.constant 0 : index
      %c0_11 = arith.constant 0 : index
      %12 = vector.load %arg7[%c0_10, %c0_11] : memref<128x128xf32, #tpu.memory_space<vmem>>, vector<128x128xf32>
      %c0_12 = arith.constant 0 : index
      %c0_13 = arith.constant 0 : index
      %13 = vector.load %arg4[%c0_12, %c0_13] : memref<128x1xf32, #tpu.memory_space<vmem>>, vector<128x1xf32>
      %14 = vector.broadcast %13 : vector<128x1xf32> to vector<128x128xf32>
      %15 = arith.mulf %12, %14 : vector<128x128xf32>
      %c0_14 = arith.constant 0 : index
      %c0_15 = arith.constant 0 : index
      %16 = vector.load %arg5[%c0_14, %c0_15] : memref<128x128xf32, #tpu.memory_space<vmem>>, vector<128x128xf32>
      %cst_16 = arith.constant dense<0.000000e+00> : vector<128x128xf32>
      %17 = tpu.matmul %15, %16, %cst_16 {dimension_numbers = #tpu.dot_dimension_numbers<[1], [0], [0], [1], [0, 0, 1, 1], [], []>} : vector<128x128xf32>, vector<128x128xf32>, vector<128x128xf32> -> vector<128x128xf32>
      %c0_17 = arith.constant 0 : index
      %c0_18 = arith.constant 0 : index
      %18 = vector.load %arg6[%c0_17, %c0_18] : memref<128x128xf32, #tpu.memory_space<vmem>>, vector<128x128xf32>
      tpu.vector_store %arg6[%c0_17, %c0_18], %17 {strides = array<i32>} : memref<128x128xf32, #tpu.memory_space<vmem>>, vector<128x128xf32>,
    } else {
    }
    return
  }
  func.func @transform_0(%arg0: i32, %arg1: i32) -> (i32, i32) {
    %c0_i32 = arith.constant 0 : i32
    return %arg0, %arg1 : i32, i32
  }
  func.func @transform_1(%arg0: i32, %arg1: i32) -> (i32, i32) {
    %c0_i32 = arith.constant 0 : i32
    %c0_i32_0 = arith.constant 0 : i32
    return %arg1, %c0_i32 : i32, i32
  }
  func.func @transform_2(%arg0: i32, %arg1: i32) -> (i32, i32) {
    %c0_i32 = arith.constant 0 : i32
    %c0_i32_0 = arith.constant 0 : i32
    return %arg0, %c0_i32 : i32, i32
  }
  func.func @transform_3(%arg0: i32, %arg1: i32) -> (i32, i32) {
    %c0_i32 = arith.constant 0 : i32
    %c0_i32_0 = arith.constant 0 : i32
    %c0_i32_1 = arith.constant 0 : i32
    return %c0_i32, %c0_i32_0 : i32, i32
  }
  func.func @transform_4(%arg0: i32, %arg1: i32) -> (i32, i32) {
    %c0_i32 = arith.constant 0 : i32
    %c0_i32_0 = arith.constant 0 : i32
    return %arg0, %c0_i32 : i32, i32
  }
}

</mosaic_0001>

<bundles_post_ra>
// kernel: graph_conv.1
= control target key start
LH: loop header
LB: loop body
LE: loop exit
PB: predicated region body
PF: predicated region fallthrough
CT: control target
= control target key end

     0   :  { %v602_v1 = vmov 0   ;;  %s820_s1 = inlined_call_operand.vmem [shape: bf16[128,128], index: 1, kind: input, shape index: {}]   ;;  %s821_s2 = inlined_call_operand.vmem [shape: f32[128,1], index: 2, kind: input, shape index: {}]   ;;  %s822_s0 = inlined_call_operand.vmem [shape: bf16[128,128], index: 0, kind: input, shape index: {}]   ;;  %s823_s3 = inlined_call_operand.vmem [shape: f32[128,128], index: 3, kind: input, shape index: {}]   ;;  %s824_s4 = inlined_call_operand.vmem [shape: f32[128,128], index: 4, kind: output, shape index: {}]  }
   0x1   :  { %v573_v0 = vld [vmem:[%s820_s1 + $0x38] sm:$0xff]  ;;  %599 = vset.pattern.permute.xlu0 %v602_v1  ;;  %v289_v2 = vld [vmem:[%s821_s2 + $0x40] sm:$0xff]  ;;  %600 = vset.pattern.permute.xlu1 %v602_v1  ;;  %v572_v3 = vld [vmem:[%s820_s1 + $0x30] sm:$0xff] }
   0x2   :  { %339 = vperm.xlu0 %599, %v289_v2   ;;  %601 = vset.pattern.permute.xlu2 %v602_v1  ;;  %v290_v4 = vld [vmem:[%s821_s2 + $0x48] sm:$0xff]  ;;  %v281_v6 = vld [vmem:[%s821_s2] sm:$0xff]  ;;  %v569_v9 = vld [vmem:[%s820_s1 + $0x18] sm:$0xff] }
   0x3   :  { %181 = vmatpush.bf16.msra.mxu0 %v573_v0  ;;  %574 = vmatpush.bf16.msra.mxu2 %v573_v0  ;;  %v571_v5 = vld [vmem:[%s820_s1 + $0x28] sm:$0xff]  ;;  %v570_v8 = vld [vmem:[%s820_s1 + $0x20] sm:$0xff]  ;;  %v292_v10 = vld [vmem:[%s821_s2 + $0x58] sm:$0xff] }
   0x4   :  { %344 = vperm.xlu1 %600, %v290_v4   ;;  %v282_v7 = vld [vmem:[%s821_s2 + $0x8] sm:$0xff]  ;;  %v284_v11 = vld [vmem:[%s821_s2 + $0x18] sm:$0xff]  ;;  %v291_v12 = vld [vmem:[%s821_s2 + $0x50] sm:$0xff] }
   0x5   :  { %v568_v13 = vld [vmem:[%s820_s1 + $0x10] sm:$0xff]  ;;  %349 = vperm.xlu2 %601, %v291_v12   ;;  %v567_v14 = vld [vmem:[%s820_s1 + $0x8] sm:$0xff]  ;;  %v285_v15 = vld [vmem:[%s821_s2 + $0x20] sm:$0xff] }
   0x6   :  { %v294_v16 = vld [vmem:[%s821_s2 + $0x68] sm:$0xff]  ;;  %v283_v17 = vld [vmem:[%s821_s2 + $0x10] sm:$0xff]  ;;  %v566_v18 = vld [vmem:[%s820_s1] sm:$0xff] }
   0x7   :  { %182 = vmatpush.bf16.msra.mxu0 %v572_v3  ;;  %575 = vmatpush.bf16.msra.mxu2 %v572_v3  ;;  %v558_v19 = vld [vmem:[%s822_s0] sm:$0xff]  ;;  %v295_v21 = vld [vmem:[%s821_s2 + $0x70] sm:$0xff]  ;;  %v288_v24 = vld [vmem:[%s821_s2 + $0x38] sm:$0xff] }
   0x8   :  { %v562_v20 = vld [vmem:[%s822_s0 + $0x20] sm:$0xff]  ;;  %v287_v22 = vld [vmem:[%s821_s2 + $0x30] sm:$0xff]  ;;  %v286_v25 = vld [vmem:[%s821_s2 + $0x28] sm:$0xff] }
   0x9   :  { %v293_v23 = vld [vmem:[%s821_s2 + $0x60] sm:$0xff]  ;;  %v559_v26 = vld [vmem:[%s822_s0 + $0x8] sm:$0xff]  ;;  %v296_v28 = vld [vmem:[%s821_s2 + $0x78] sm:$0xff] }
   0xa   :  { %299 = vperm.xlu0 %599, %v281_v6   ;;  %v563_v27 = vld [vmem:[%s822_s0 + $0x28] sm:$0xff]  ;;  %v560_v29 = vld [vmem:[%s822_s0 + $0x10] sm:$0xff]  ;;  %v561_v31 = vld [vmem:[%s822_s0 + $0x18] sm:$0xff] }
   0xb   :  { %183 = vmatpush.bf16.msra.mxu0 %v571_v5  ;;  %576 = vmatpush.bf16.msra.mxu2 %v571_v5  ;;  %v564_v30 = vld [vmem:[%s822_s0 + $0x30] sm:$0xff]  ;;  %v565_v32 = vld [vmem:[%s822_s0 + $0x38] sm:$0xff]  ;;  %v406_v35 = vld [vmem:[%s823_s3 + $0x68] sm:$0xff] }
   0xc   :  { %304 = vperm.xlu1 %600, %v282_v7   ;;  %v408_v33 = vld [vmem:[%s823_s3 + $0x78] sm:$0xff]  ;;  %v407_v34 = vld [vmem:[%s823_s3 + $0x70] sm:$0xff]  ;;  %v405_v36 = vld [vmem:[%s823_s3 + $0x60] sm:$0xff] }
   0xd   :  { %309 = vperm.xlu2 %601, %v283_v17   ;;  %409 = vmatpush.msra.mxu1 %v408_v33  ;;  %v404_v37 = vld [vmem:[%s823_s3 + $0x58] sm:$0xff]  ;;  %v403_v38 = vld [vmem:[%s823_s3 + $0x50] sm:$0xff]  ;;  %v402_v39 = vld [vmem:[%s823_s3 + $0x48] sm:$0xff] }
   0xe   :  { %582 = vmatpush.msra.mxu3 %v408_v33  ;;  %v401_v40 = vld [vmem:[%s823_s3 + $0x40] sm:$0xff]  ;;  %v400_v41 = vld [vmem:[%s823_s3 + $0x38] sm:$0xff]  ;;  %v399_v42 = vld [vmem:[%s823_s3 + $0x30] sm:$0xff] }
   0xf   :  { %184 = vmatpush.bf16.msra.mxu0 %v570_v8  ;;  %577 = vmatpush.bf16.msra.mxu2 %v570_v8  ;;  %v398_v43 = vld [vmem:[%s823_s3 + $0x28] sm:$0xff]  ;;  %v397_v44 = vld [vmem:[%s823_s3 + $0x20] sm:$0xff]  ;;  %v396_v45 = vld [vmem:[%s823_s3 + $0x18] sm:$0xff] }
  0x10   :  { %410 = vmatpush.msra.mxu1 %v407_v34  ;;  %583 = vmatpush.msra.mxu3 %v407_v34  ;;  %v395_v46 = vld [vmem:[%s823_s3 + $0x10] sm:$0xff]  ;;  %v394_v47 = vld [vmem:[%s823_s3 + $0x8] sm:$0xff]  ;;  %v393_v48 = vld [vmem:[%s823_s3] sm:$0xff] }
  0x12   :  { %354 = vperm.xlu0 %599, %v292_v10   ;;  %411 = vmatpush.msra.mxu1 %v406_v35 }
  0x13   :  { %185 = vmatpush.bf16.msra.mxu0 %v569_v9  ;;  %578 = vmatpush.bf16.msra.mxu2 %v569_v9 }
  0x14   :  { %314 = vperm.xlu1 %600, %v284_v11   ;;  %584 = vmatpush.msra.mxu3 %v406_v35 }
  0x15   :  { %359 = vperm.xlu2 %601, %v293_v23   ;;  %412 = vmatpush.msra.mxu1 %v405_v36 }
  0x16   :  { %585 = vmatpush.msra.mxu3 %v405_v36 }
  0x17   :  { %186 = vmatpush.bf16.msra.mxu0 %v568_v13  ;;  %579 = vmatpush.bf16.msra.mxu2 %v568_v13 }
  0x18   :  { %413 = vmatpush.msra.mxu1 %v404_v37  ;;  %586 = vmatpush.msra.mxu3 %v404_v37 }
  0x1a   :  { %319 = vperm.xlu0 %599, %v285_v15   ;;  %414 = vmatpush.msra.mxu1 %v403_v38 }
  0x1b   :  { %187 = vmatpush.bf16.msra.mxu0 %v567_v14  ;;  %580 = vmatpush.bf16.msra.mxu2 %v567_v14 }
  0x1c   :  { %364 = vperm.xlu1 %600, %v294_v16   ;;  %587 = vmatpush.msra.mxu3 %v403_v38 }
  0x1d   :  { %324 = vperm.xlu2 %601, %v286_v25   ;;  %415 = vmatpush.msra.mxu1 %v402_v39 }
  0x1e   :  { %588 = vmatpush.msra.mxu3 %v402_v39 }
  0x1f   :  { %188 = vmatpush.bf16.msra.mxu0 %v566_v18  ;;  %581 = vmatpush.bf16.msra.mxu2 %v566_v18 }
  0x20   :  { %416 = vmatpush.msra.mxu1 %v401_v40  ;;  %589 = vmatpush.msra.mxu3 %v401_v40 }
  0x22   :  { %189 = vmatmul.bf16.vlgmr.msra.gmra.mxu0 %v558_v19  ;;  %209 = vmatmul.bf16.vlgmr.msra.gmra.mxu2 %v562_v20 }
  0x23   :  { %369 = vperm.xlu0 %599, %v295_v21   ;;  %417 = vmatpush.msra.mxu1 %v400_v41 }
  0x24   :  { %329 = vperm.xlu1 %600, %v287_v22   ;;  %590 = vmatpush.msra.mxu3 %v400_v41 }
  0x25   :  { %374 = vperm.xlu2 %601, %v296_v28   ;;  %418 = vmatpush.msra.mxu1 %v399_v42 }
  0x26   :  { %591 = vmatpush.msra.mxu3 %v399_v42 }
  0x27   :  { %419 = vmatpush.msra.mxu1 %v398_v43 }
  0x28   :  { %592 = vmatpush.msra.mxu3 %v398_v43 }
  0x29   :  { %420 = vmatpush.msra.mxu1 %v397_v44 }
  0x2a   :  { %593 = vmatpush.msra.mxu3 %v397_v44 }
  0x2b   :  { %334 = vperm.xlu0 %599, %v288_v24   ;;  %421 = vmatpush.msra.mxu1 %v396_v45 }
  0x2c   :  { %594 = vmatpush.msra.mxu3 %v396_v45 }
  0x2d   :  { %422 = vmatpush.msra.mxu1 %v395_v46 }
  0x2e   :  { %595 = vmatpush.msra.mxu3 %v395_v46 }
  0x2f   :  { %423 = vmatpush.msra.mxu1 %v394_v47 }
  0x30   :  { %596 = vmatpush.msra.mxu3 %v394_v47 }
  0x31   :  { %424 = vmatpush.msra.mxu1 %v393_v48 }
  0x32   :  { %194 = vmatmul.bf16.gmra.mxu0 %v559_v26  ;;  %214 = vmatmul.bf16.gmra.mxu2 %v563_v27 }
  0x33   :  { %597 = vmatpush.msra.mxu3 %v393_v48 }
  0x42   :  { %199 = vmatmul.bf16.gmra.mxu0 %v560_v29  ;;  %219 = vmatmul.bf16.gmra.mxu2 %v564_v30 }
  0x52   :  { %204 = vmatmul.bf16.gmra.mxu0 %v561_v31  ;;  %224 = vmatmul.bf16.gmra.mxu2 %v565_v32 }
  0x5f   :  { %v350_v54 = vpop.permute.xlu2 %349 }
  0x67   :  { %v310_v62 = vpop.permute.xlu2 %309 }
  0x6f   :  { %v360_v7 = vpop.permute.xlu2 %359 }
  0x74   :  { %v340_v49 = vpop.permute.xlu0 %339 }
  0x76   :  { %v345_v50 = vpop.permute.xlu1 %344 }
  0x77   :  { %v325_v16 = vpop.permute.xlu2 %324 }
  0x7c   :  { %v300_v51 = vpop.permute.xlu0 %299 }
  0x7e   :  { %v305_v57 = vpop.permute.xlu1 %304 }
  0x7f   :  { %v375_v30 = vpop.permute.xlu2 %374 }
  0x84   :  { %v355_v1 = vpop.permute.xlu0 %354 }
  0x86   :  { %v315_v4 = vpop.permute.xlu1 %314 }
  0x8c   :  { %v320_v10 = vpop.permute.xlu0 %319 }
  0x8e   :  { %v365_v13 = vpop.permute.xlu1 %364 }
  0x95   :  { %v370_v19 = vpop.permute.xlu0 %369 }
  0x96   :  { %v330_v22 = vpop.permute.xlu1 %329 }
  0x9d   :  { %v335_v27 = vpop.permute.xlu0 %334 }
  0x9f   :  { %v190_v52 = vpop.f32.mrf.mxu0 }
  0xa0   :  { %v377_v53 = vmul.f32 %v300_v51, %v190_v52 }
  0xa2   :  { %425 = vmatmul.f32.vlgmr.msra.gmra.mxu1 %v377_v53 }
  0xa5   :  { %v210_v55 = vpop.f32.mrf.mxu2 }
  0xa6   :  { %v385_v56 = vmul.f32 %v340_v49, %v210_v55 }
  0xa7   :  { %v192_v58 = vpop.f32.mrf.mxu0 }
  0xa8   :  { %v378_v59 = vmul.f32 %v305_v57, %v192_v58  ;;  %449 = vmatmul.f32.vlgmr.msra.gmra.mxu3 %v385_v56 }
  0xaa   :  { %428 = vmatmul.f32.gmra.mxu1 %v378_v59 }
  0xad   :  { %v212_v60 = vpop.f32.mrf.mxu2 }
  0xae   :  { %v386_v61 = vmul.f32 %v345_v50, %v212_v60 }
  0xaf   :  { %v195_v63 = vpop.f32.mrf.mxu0 }
  0xb0   :  { %v379_v0 = vmul.f32 %v310_v62, %v195_v63  ;;  %452 = vmatmul.f32.gmra.mxu3 %v386_v61 }
  0xb2   :  { %431 = vmatmul.f32.gmra.mxu1 %v379_v0 }
  0xb5   :  { %v215_v2 = vpop.f32.mrf.mxu2 }
  0xb6   :  { %v387_v3 = vmul.f32 %v350_v54, %v215_v2 }
  0xb7   :  { %v197_v5 = vpop.f32.mrf.mxu0 }
  0xb8   :  { %v380_v6 = vmul.f32 %v315_v4, %v197_v5  ;;  %455 = vmatmul.f32.gmra.mxu3 %v387_v3 }
  0xba   :  { %434 = vmatmul.f32.gmra.mxu1 %v380_v6 }
  0xbd   :  { %v217_v8 = vpop.f32.mrf.mxu2 }
  0xbe   :  { %v388_v9 = vmul.f32 %v355_v1, %v217_v8 }
  0xbf   :  { %v200_v11 = vpop.f32.mrf.mxu0 }
  0xc0   :  { %v381_v12 = vmul.f32 %v320_v10, %v200_v11  ;;  %458 = vmatmul.f32.gmra.mxu3 %v388_v9 }
  0xc2   :  { %437 = vmatmul.f32.gmra.mxu1 %v381_v12 }
  0xc5   :  { %v220_v14 = vpop.f32.mrf.mxu2 }
  0xc6   :  { %v389_v15 = vmul.f32 %v360_v7, %v220_v14 }
  0xc7   :  { %v202_v17 = vpop.f32.mrf.mxu0 }
  0xc8   :  { %v382_v18 = vmul.f32 %v325_v16, %v202_v17  ;;  %461 = vmatmul.f32.gmra.mxu3 %v389_v15 }
  0xca   :  { %440 = vmatmul.f32.gmra.mxu1 %v382_v18 }
  0xcd   :  { %v222_v20 = vpop.f32.mrf.mxu2 }
  0xce   :  { %v390_v21 = vmul.f32 %v365_v13, %v222_v20 }
  0xcf   :  { %v205_v23 = vpop.f32.mrf.mxu0 }
  0xd0   :  { %v383_v24 = vmul.f32 %v330_v22, %v205_v23  ;;  %464 = vmatmul.f32.gmra.mxu3 %v390_v21 }
  0xd2   :  { %443 = vmatmul.f32.gmra.mxu1 %v383_v24 }
  0xd5   :  { %v225_v25 = vpop.f32.mrf.mxu2 }
  0xd6   :  { %v391_v26 = vmul.f32 %v370_v19, %v225_v25 }
  0xd7   :  { %v207_v28 = vpop.f32.mrf.mxu0 }
  0xd8   :  { %v384_v29 = vmul.f32 %v335_v27, %v207_v28  ;;  %467 = vmatmul.f32.gmra.mxu3 %v391_v26 }
  0xda   :  { %446 = vmatmul.f32.gmra.mxu1 %v384_v29 }
  0xdd   :  { %v227_v31 = vpop.f32.mrf.mxu2 }
  0xde   :  { %v392_v32 = vmul.f32 %v375_v30, %v227_v31 }
  0xe0   :  { %470 = vmatmul.f32.gmra.mxu3 %v392_v32 }
 0x11f   :  { %v426_v33 = vpop.f32.mrf.mxu1 }
 0x120   :  { %474 = vst [vmem:[%s824_s4] sm:$0xff] %v426_v33 }
 0x127   :  { %v429_v34 = vpop.f32.mrf.mxu1 }
 0x128   :  { %475 = vst [vmem:[%s824_s4 + $0x8] sm:$0xff] %v429_v34 }
 0x12b   :  { %v450_v35 = vpop.f32.mrf.mxu3 }
 0x12c   :  { %482 = vst [vmem:[%s824_s4 + $0x40] sm:$0xff] %v450_v35 }
 0x12f   :  { %v432_v36 = vpop.f32.mrf.mxu1 }
 0x130   :  { %476 = vst [vmem:[%s824_s4 + $0x10] sm:$0xff] %v432_v36 }
 0x133   :  { %v453_v37 = vpop.f32.mrf.mxu3 }
 0x134   :  { %483 = vst [vmem:[%s824_s4 + $0x48] sm:$0xff] %v453_v37 }
 0x137   :  { %v435_v38 = vpop.f32.mrf.mxu1 }
 0x138   :  { %477 = vst [vmem:[%s824_s4 + $0x18] sm:$0xff] %v435_v38 }
 0x13b   :  { %v456_v39 = vpop.f32.mrf.mxu3 }
 0x13c   :  { %484 = vst [vmem:[%s824_s4 + $0x50] sm:$0xff] %v456_v39 }
 0x13f   :  { %v438_v40 = vpop.f32.mrf.mxu1 }
 0x140   :  { %478 = vst [vmem:[%s824_s4 + $0x20] sm:$0xff] %v438_v40 }
 0x143   :  { %v459_v41 = vpop.f32.mrf.mxu3 }
 0x144   :  { %485 = vst [vmem:[%s824_s4 + $0x58] sm:$0xff] %v459_v41 }
 0x147   :  { %v441_v42 = vpop.f32.mrf.mxu1 }
 0x148   :  { %479 = vst [vmem:[%s824_s4 + $0x28] sm:$0xff] %v441_v42 }
 0x14b   :  { %v462_v43 = vpop.f32.mrf.mxu3 }
 0x14c   :  { %486 = vst [vmem:[%s824_s4 + $0x60] sm:$0xff] %v462_v43 }
 0x14f   :  { %v444_v44 = vpop.f32.mrf.mxu1 }
 0x150   :  { %480 = vst [vmem:[%s824_s4 + $0x30] sm:$0xff] %v444_v44 }
 0x153   :  { %v465_v45 = vpop.f32.mrf.mxu3 }
 0x154   :  { %487 = vst [vmem:[%s824_s4 + $0x68] sm:$0xff] %v465_v45 }
 0x157   :  { %v447_v46 = vpop.f32.mrf.mxu1 }
 0x158   :  { %481 = vst [vmem:[%s824_s4 + $0x38] sm:$0xff] %v447_v46 }
 0x15b   :  { %v468_v47 = vpop.f32.mrf.mxu3 }
 0x15c   :  { %488 = vst [vmem:[%s824_s4 + $0x70] sm:$0xff] %v468_v47 }
 0x163   :  { %v471_v48 = vpop.f32.mrf.mxu3 }
 0x164   :  { %489 = vst [vmem:[%s824_s4 + $0x78] sm:$0xff] %v471_v48 }

</bundles_post_ra>
